<compile_context>
chip_gen: v5e
topology: v5e:2x2
jax: 0.10.0
libtpu: 0.0.40
codegen_flags: <defaults>
</compile_context>

<pallas_src>
import functools

import jax
import jax.numpy as jnp
from jax import lax
from jax.experimental import pallas as pl
from jax.experimental.pallas import tpu as pltpu


def _round_up(x, m):
    return ((x + m - 1) // m) * m


def _concat_conv_kernel(x_ref, w_ref, b_ref, o_ref, col_ref, *,
                        K, W, cin_pad, fout, fpad):
    """One batch tile per grid step.

    x_ref   : VMEM (tile_b, Cin_pad, H*W)        flat-spatial input (lane = H*W)
    w_ref   : VMEM (Cout, K*K*Cin_pad)           tap-major weights (kh, kw, ci)
    b_ref   : VMEM (Cout, 1)                     effective bias (bias + t-channel)
    o_ref   : VMEM (tile_b, Cout, Fpad)          lane-padded flat-spatial output
    col_ref : VMEM (K*K*Cin_pad, tile_b*Fpad)    im2col RHS; 128-aligned slot/image
    """
    tile_b = x_ref.shape[0]

    # --- im2col -----------------------------------------------------------
    # Each (kh, kw) tap is a static lane-shift of the flat spatial axis.
    # Every image owns a 128-lane-aligned Fpad slot in the RHS, so all stores
    # start on a lane-tile boundary; Cin is padded to the f32 sublane tile in
    # the wrapper, so stores cover whole sublane tiles.  Lanes [fout, fpad)
    # of each slot are never written -> the matching output lanes are garbage
    # that the wrapper slices off (being RHS lanes, not contraction rows,
    # they can never contaminate valid lanes).
    for kh in range(K):
        for kw in range(K):
            j = kh * K + kw
            d = kh * W + kw
            for b in range(tile_b):
                col_ref[j * cin_pad:(j + 1) * cin_pad,
                        b * fpad:b * fpad + fout] = x_ref[b, :, d:d + fout]

    # --- one wide, deep MXU call for the whole batch tile ------------------
    #   (Cout, K*K*Cin_pad) x (K*K*Cin_pad, tile_b*Fpad), f32 accumulation.
    acc = jnp.dot(w_ref[...], col_ref[...], preferred_element_type=jnp.float32)
    acc = acc + b_ref[...]                 # single wide bias broadcast (hoisted)
    acc = acc.astype(o_ref.dtype)          # single wide cast (hoisted)

    # --- per-image, 128-aligned, full-width output stores -------------------
    for b in range(tile_b):
        o_ref[b] = acc[:, b * fpad:(b + 1) * fpad]


def _pick_tile_b(n, cin_pad, cout, hw, fpad, k):
    """Largest batch tile under a conservative (v7x-safe) VMEM budget, while
    keeping >= 2 grid steps so v7x can shard the batch across both TCs."""
    bytes_per_img = 4 * (
        k * k * cin_pad * fpad      # im2col scratch (whole-kernel lifetime)
        + 2 * cin_pad * hw          # double-buffered input tile
        + 3 * cout * fpad           # double-buffered output tile + accumulator
    )
    budget = 20 << 20               # headroom under v7x 32 MiB scoped / 64 MiB phys
    cap = max(1, budget // bytes_per_img)
    cap = min(cap, 32)              # diminishing returns / vreg pressure
    if n >= 2:
        cap = min(cap, n // 2)      # >= 2 grid steps -> both v7x TensorCores busy
    return int(max(1, min(cap, n)))


@jax.jit
def concat_conv2d(t, x_nchw, w_oihw, b):
    """Pallas implementation of ConcatConv2d.forward (default config).

    t      : scalar (float)
    x_nchw : (N, Cin, H, W)
    w_oihw : (Cout, Cin+1, K, K)   -- PyTorch Conv2d weight layout
    b      : (Cout,)
    returns: (N, Cout, H-K+1, W-K+1)

    The constant t-channel is folded into an effective bias
        bias'[o] = b[o] + t * sum_{kh,kw} W[o, 0, kh, kw]
    which is exact only because padding=0, stride=1, dilation=1, groups=1
    (the module defaults).
    """
    N, Cin, H, W = x_nchw.shape
    Cout, Cin_p1, K, K2 = w_oihw.shape
    assert Cin_p1 == Cin + 1 and K == K2
    Ho, Wo = H - K + 1, W - K + 1
    HW = H * W
    Fout = (Ho - 1) * W + Wo          # valid flat-spatial output length
    Fpad = _round_up(Ho * W, 128)     # lane-dense per-image output slot (>= Ho*W)
    Cin_pad = _round_up(Cin, 8)       # f32 sublane tile

    # --- layout plumbing: reshapes + zero pads only, no activation transposes
    x_flat = x_nchw.reshape(N, Cin, HW)
    if Cin_pad != Cin:
        x_flat = jnp.pad(x_flat, ((0, 0), (0, Cin_pad - Cin), (0, 0)))

    # Real-input-channel weights, tap-major: (Cout,K,K,Cin_pad) -> (Cout, K*K*Cin_pad)
    w_x = jnp.transpose(w_oihw[:, 1:, :, :], (0, 2, 3, 1))
    if Cin_pad != Cin:
        w_x = jnp.pad(w_x, ((0, 0), (0, 0), (0, 0), (0, Cin_pad - Cin)))
    w_x = w_x.reshape(Cout, K * K * Cin_pad).astype(x_nchw.dtype)

    # t-channel folded into the bias (exact: padding=0, stride=1, dilation=1).
    bias_eff = b + t * jnp.sum(w_oihw[:, 0, :, :], axis=(-2, -1))
    bias_eff = bias_eff.reshape(Cout, 1).astype(jnp.float32)

    # --- batch tiling -------------------------------------------------------
    tile_b = _pick_tile_b(N, Cin_pad, Cout, HW, Fpad, K)
    grid = pl.cdiv(N, tile_b)
    Npad = grid * tile_b
    if Npad != N:                     # ragged batch: pad with zero images
        x_flat = jnp.pad(x_flat, ((0, Npad - N), (0, 0), (0, 0)))

    kernel = functools.partial(_concat_conv_kernel, K=K, W=W,
                               cin_pad=Cin_pad, fout=Fout, fpad=Fpad)

    out_flat = pl.pallas_call(
        kernel,
        out_shape=jax.ShapeDtypeStruct((Npad, Cout, Fpad), x_nchw.dtype),
        grid=(grid,),
        in_specs=[
            pl.BlockSpec((tile_b, Cin_pad, HW), lambda i: (i, 0, 0)),   # x
            pl.BlockSpec((Cout, K * K * Cin_pad), lambda i: (0, 0)),    # weights
            pl.BlockSpec((Cout, 1), lambda i: (0, 0)),                  # bias'
        ],
        out_specs=pl.BlockSpec((tile_b, Cout, Fpad), lambda i: (i, 0, 0)),
        scratch_shapes=[
            pltpu.VMEM((K * K * Cin_pad, tile_b * Fpad), x_nchw.dtype),
        ],
        compiler_params=pltpu.CompilerParams(
            dimension_semantics=("parallel",),     # batch tiles independent
            vmem_limit_bytes=32 * 1024 * 1024,     # explicit, v7x-safe budget
        ),
    )(x_flat, w_x, bias_eff)

    # --- un-flatten: slice + (bitcast) reshape + slice — no output pad ------
    out = out_flat[:N, :, :Ho * W].reshape(N, Cout, Ho, W)[:, :, :, :Wo]
    return out


def _reference(t, x_nchw, w_oihw, b):
    """Pure-JAX reference matching the PyTorch forward exactly (NCHW)."""
    tt = jnp.ones_like(x_nchw[:, :1, :, :]) * t
    ttx = jnp.concatenate([tt, x_nchw], axis=1)
    out = lax.conv_general_dilated(
        ttx, w_oihw,
        window_strides=(1, 1),
        padding="VALID",
        dimension_numbers=("NCHW", "OIHW", "NCHW"),
    )
    return out + b[None, :, None, None]


if __name__ == "__main__":
    # Small deterministic shapes consistent with the module defaults.
    N, Cin, H, W = 2, 4, 16, 16
    Cout, K = 8, 3

    key = jax.random.PRNGKey(0)
    kx, kw, kb, kt = jax.random.split(key, 4)

    x = jax.random.normal(kx, (N, Cin, H, W), dtype=jnp.float32)
    w = jax.random.normal(kw, (Cout, Cin + 1, K, K), dtype=jnp.float32) * 0.1
    b = jax.random.normal(kb, (Cout,), dtype=jnp.float32) * 0.1
    t = float(jax.random.uniform(kt, ()))

    out = jax.block_until_ready(concat_conv2d(t, x, w, b))
    ref = jax.block_until_ready(_reference(t, x, w, b))

    assert out.shape == (N, Cout, H - K + 1, W - K + 1), out.shape
    assert jnp.allclose(out, ref, atol=1e-4, rtol=1e-4), float(
        jnp.max(jnp.abs(out - ref))
    )

    print("KERNEL_OK")
</pallas_src>

<mosaic_0001>
module attributes {stable_mosaic.version = 11 : i64} {
  func.func @_concat_conv_kernel(%arg0: i32, %arg1: memref<1x8x256xf32, #tpu.memory_space<vmem>>, %arg2: memref<8x72xf32, #tpu.memory_space<vmem>>, %arg3: memref<8x1xf32, #tpu.memory_space<vmem>>, %arg4: memref<1x8x256xf32, #tpu.memory_space<vmem>>, %arg5: memref<72x256xf32, #tpu.memory_space<vmem>>) attributes {dimension_semantics = [#tpu.dimension_semantics<parallel>], iteration_bounds = array<i64: 2>, scalar_prefetch = 0 : i64, scratch_operands = 1 : i64, tpu.core_type = #tpu.core_type<tc>, window_params = [{transform_indices = @transform_0, window_bounds = array<i64: 1, 8, 256>}, {pipeline_mode = #tpu.pipeline_mode<synchronous>, transform_indices = @transform_1, window_bounds = array<i64: 8, 72>}, {pipeline_mode = #tpu.pipeline_mode<synchronous>, transform_indices = @transform_2, window_bounds = array<i64: 8, 1>}, {transform_indices = @transform_3, window_bounds = array<i64: 1, 8, 256>}]} {
    %c0 = arith.constant 0 : index
    %c0_0 = arith.constant 0 : index
    %c0_1 = arith.constant 0 : index
    %0 = vector.load %arg1[%c0, %c0_0, %c0_1] : memref<1x8x256xf32, #tpu.memory_space<vmem>>, vector<1x8x222xf32>
    %1 = vector.shape_cast %0 : vector<1x8x222xf32> to vector<8x222xf32>
    %c0_2 = arith.constant 0 : index
    %c0_3 = arith.constant 0 : index
    %2 = vector.load %arg5[%c0_2, %c0_3] : memref<72x256xf32, #tpu.memory_space<vmem>>, vector<8x222xf32>
    tpu.vector_store %arg5[%c0_2, %c0_3], %1 {strides = array<i32>} : memref<72x256xf32, #tpu.memory_space<vmem>>, vector<8x222xf32>,
    %c0_4 = arith.constant 0 : index
    %c0_5 = arith.constant 0 : index
    %c1 = arith.constant 1 : index
    %3 = vector.load %arg1[%c0_4, %c0_5, %c1] : memref<1x8x256xf32, #tpu.memory_space<vmem>>, vector<1x8x222xf32>
    %4 = vector.shape_cast %3 : vector<1x8x222xf32> to vector<8x222xf32>
    %c8 = arith.constant 8 : index
    %c0_6 = arith.constant 0 : index
    %5 = vector.load %arg5[%c8, %c0_6] : memref<72x256xf32, #tpu.memory_space<vmem>>, vector<8x222xf32>
    tpu.vector_store %arg5[%c8, %c0_6], %4 {strides = array<i32>} : memref<72x256xf32, #tpu.memory_space<vmem>>, vector<8x222xf32>,
    %c0_7 = arith.constant 0 : index
    %c0_8 = arith.constant 0 : index
    %c2 = arith.constant 2 : index
    %6 = vector.load %arg1[%c0_7, %c0_8, %c2] : memref<1x8x256xf32, #tpu.memory_space<vmem>>, vector<1x8x222xf32>
    %7 = vector.shape_cast %6 : vector<1x8x222xf32> to vector<8x222xf32>
    %c16 = arith.constant 16 : index
    %c0_9 = arith.constant 0 : index
    %8 = vector.load %arg5[%c16, %c0_9] : memref<72x256xf32, #tpu.memory_space<vmem>>, vector<8x222xf32>
    tpu.vector_store %arg5[%c16, %c0_9], %7 {strides = array<i32>} : memref<72x256xf32, #tpu.memory_space<vmem>>, vector<8x222xf32>,
    %c0_10 = arith.constant 0 : index
    %c0_11 = arith.constant 0 : index
    %c16_12 = arith.constant 16 : index
    %9 = vector.load %arg1[%c0_10, %c0_11, %c16_12] : memref<1x8x256xf32, #tpu.memory_space<vmem>>, vector<1x8x222xf32>
    %10 = vector.shape_cast %9 : vector<1x8x222xf32> to vector<8x222xf32>
    %c24 = arith.constant 24 : index
    %c0_13 = arith.constant 0 : index
    %11 = vector.load %arg5[%c24, %c0_13] : memref<72x256xf32, #tpu.memory_space<vmem>>, vector<8x222xf32>
    tpu.vector_store %arg5[%c24, %c0_13], %10 {strides = array<i32>} : memref<72x256xf32, #tpu.memory_space<vmem>>, vector<8x222xf32>,
    %c0_14 = arith.constant 0 : index
    %c0_15 = arith.constant 0 : index
    %c17 = arith.constant 17 : index
    %12 = vector.load %arg1[%c0_14, %c0_15, %c17] : memref<1x8x256xf32, #tpu.memory_space<vmem>>, vector<1x8x222xf32>
    %13 = vector.shape_cast %12 : vector<1x8x222xf32> to vector<8x222xf32>
    %c32 = arith.constant 32 : index
    %c0_16 = arith.constant 0 : index
    %14 = vector.load %arg5[%c32, %c0_16] : memref<72x256xf32, #tpu.memory_space<vmem>>, vector<8x222xf32>
    tpu.vector_store %arg5[%c32, %c0_16], %13 {strides = array<i32>} : memref<72x256xf32, #tpu.memory_space<vmem>>, vector<8x222xf32>,
    %c0_17 = arith.constant 0 : index
    %c0_18 = arith.constant 0 : index
    %c18 = arith.constant 18 : index
    %15 = vector.load %arg1[%c0_17, %c0_18, %c18] : memref<1x8x256xf32, #tpu.memory_space<vmem>>, vector<1x8x222xf32>
    %16 = vector.shape_cast %15 : vector<1x8x222xf32> to vector<8x222xf32>
    %c40 = arith.constant 40 : index
    %c0_19 = arith.constant 0 : index
    %17 = vector.load %arg5[%c40, %c0_19] : memref<72x256xf32, #tpu.memory_space<vmem>>, vector<8x222xf32>
    tpu.vector_store %arg5[%c40, %c0_19], %16 {strides = array<i32>} : memref<72x256xf32, #tpu.memory_space<vmem>>, vector<8x222xf32>,
    %c0_20 = arith.constant 0 : index
    %c0_21 = arith.constant 0 : index
    %c32_22 = arith.constant 32 : index
    %18 = vector.load %arg1[%c0_20, %c0_21, %c32_22] : memref<1x8x256xf32, #tpu.memory_space<vmem>>, vector<1x8x222xf32>
    %19 = vector.shape_cast %18 : vector<1x8x222xf32> to vector<8x222xf32>
    %c48 = arith.constant 48 : index
    %c0_23 = arith.constant 0 : index
    %20 = vector.load %arg5[%c48, %c0_23] : memref<72x256xf32, #tpu.memory_space<vmem>>, vector<8x222xf32>
    tpu.vector_store %arg5[%c48, %c0_23], %19 {strides = array<i32>} : memref<72x256xf32, #tpu.memory_space<vmem>>, vector<8x222xf32>,
    %c0_24 = arith.constant 0 : index
    %c0_25 = arith.constant 0 : index
    %c33 = arith.constant 33 : index
    %21 = vector.load %arg1[%c0_24, %c0_25, %c33] : memref<1x8x256xf32, #tpu.memory_space<vmem>>, vector<1x8x222xf32>
    %22 = vector.shape_cast %21 : vector<1x8x222xf32> to vector<8x222xf32>
    %c56 = arith.constant 56 : index
    %c0_26 = arith.constant 0 : index
    %23 = vector.load %arg5[%c56, %c0_26] : memref<72x256xf32, #tpu.memory_space<vmem>>, vector<8x222xf32>
    tpu.vector_store %arg5[%c56, %c0_26], %22 {strides = array<i32>} : memref<72x256xf32, #tpu.memory_space<vmem>>, vector<8x222xf32>,
    %c0_27 = arith.constant 0 : index
    %c0_28 = arith.constant 0 : index
    %c34 = arith.constant 34 : index
    %24 = vector.load %arg1[%c0_27, %c0_28, %c34] : memref<1x8x256xf32, #tpu.memory_space<vmem>>, vector<1x8x222xf32>
    %25 = vector.shape_cast %24 : vector<1x8x222xf32> to vector<8x222xf32>
    %c64 = arith.constant 64 : index
    %c0_29 = arith.constant 0 : index
    %26 = vector.load %arg5[%c64, %c0_29] : memref<72x256xf32, #tpu.memory_space<vmem>>, vector<8x222xf32>
    tpu.vector_store %arg5[%c64, %c0_29], %25 {strides = array<i32>} : memref<72x256xf32, #tpu.memory_space<vmem>>, vector<8x222xf32>,
    %c0_30 = arith.constant 0 : index
    %c0_31 = arith.constant 0 : index
    %27 = vector.load %arg2[%c0_30, %c0_31] : memref<8x72xf32, #tpu.memory_space<vmem>>, vector<8x72xf32>
    %c0_32 = arith.constant 0 : index
    %c0_33 = arith.constant 0 : index
    %28 = vector.load %arg5[%c0_32, %c0_33] : memref<72x256xf32, #tpu.memory_space<vmem>>, vector<72x256xf32>
    %cst = arith.constant dense<0.000000e+00> : vector<8x256xf32>
    %29 = tpu.matmul %27, %28, %cst {dimension_numbers = #tpu.dot_dimension_numbers<[1], [0], [0], [1], [0, 0, 1, 1], [], []>} : vector<8x72xf32>, vector<72x256xf32>, vector<8x256xf32> -> vector<8x256xf32>
    %c0_34 = arith.constant 0 : index
    %c0_35 = arith.constant 0 : index
    %30 = vector.load %arg3[%c0_34, %c0_35] : memref<8x1xf32, #tpu.memory_space<vmem>>, vector<8x1xf32>
    %31 = vector.broadcast %30 : vector<8x1xf32> to vector<8x256xf32>
    %32 = arith.addf %29, %31 : vector<8x256xf32>
    %c0_36 = arith.constant 0 : index
    %c0_37 = arith.constant 0 : index
    %c0_38 = arith.constant 0 : index
    %33 = vector.load %arg4[%c0_36, %c0_37, %c0_38] : memref<1x8x256xf32, #tpu.memory_space<vmem>>, vector<1x8x256xf32>
    %34 = vector.shape_cast %33 : vector<1x8x256xf32> to vector<8x256xf32>
    %35 = vector.shape_cast %32 : vector<8x256xf32> to vector<1x8x256xf32>
    tpu.vector_store %arg4[%c0_36, %c0_37, %c0_38], %35 {strides = array<i32>} : memref<1x8x256xf32, #tpu.memory_space<vmem>>, vector<1x8x256xf32>,
    return
  }
  func.func @transform_0(%arg0: i32) -> (i32, i32, i32) {
    %c0_i32 = arith.constant 0 : i32
    %c0_i32_0 = arith.constant 0 : i32
    %c0_i32_1 = arith.constant 0 : i32
    return %arg0, %c0_i32, %c0_i32_0 : i32, i32, i32
  }
  func.func @transform_1(%arg0: i32) -> (i32, i32) {
    %c0_i32 = arith.constant 0 : i32
    %c0_i32_0 = arith.constant 0 : i32
    %c0_i32_1 = arith.constant 0 : i32
    return %c0_i32, %c0_i32_0 : i32, i32
  }
  func.func @transform_2(%arg0: i32) -> (i32, i32) {
    %c0_i32 = arith.constant 0 : i32
    %c0_i32_0 = arith.constant 0 : i32
    %c0_i32_1 = arith.constant 0 : i32
    return %c0_i32, %c0_i32_0 : i32, i32
  }
  func.func @transform_3(%arg0: i32) -> (i32, i32, i32) {
    %c0_i32 = arith.constant 0 : i32
    %c0_i32_0 = arith.constant 0 : i32
    %c0_i32_1 = arith.constant 0 : i32
    return %arg0, %c0_i32, %c0_i32_0 : i32, i32, i32
  }
}

</mosaic_0001>

<bundles_post_ra>
// kernel: concat_conv2d.1
= control target key start
LH: loop header
LB: loop body
LE: loop exit
PB: predicated region body
PF: predicated region fallthrough
CT: control target
= control target key end

     0   :  { %s484_s12 = smov 0   ;;  %s535_s0 = inlined_call_operand.vmem [shape: f32[2,8,256], index: 0, kind: input, shape index: {}]   ;;  %s536_s1 = inlined_call_operand.vmem [shape: f32[8,72], index: 1, kind: input, shape index: {}]   ;;  %s537_s2 = inlined_call_operand.vmem [shape: f32[8,1], index: 2, kind: input, shape index: {}]   ;;  %s538_s3 = inlined_call_operand.vmem [shape: f32[2,8,256], index: 3, kind: output, shape index: {}]  }
   0x1 LB: > { %s413_s13 = sadd.s32 4294967295, %s453_s12   ;;  %p417_p0 = scmp.ge.s32.totalorder %s453_s12, 1  ;;  %s453_s12 = sphi %s484_s12, %s13_s12  }
   0x2   : > { %p137_p1 = scmp.lt.s32.totalorder %s453_s12, 3 }
   0x4   : > { %p138_p2 = pnand %p417_p0, %p137_p1 }
   0x5   : > { %p161_p3 = scmp.lt.s32.totalorder (!%p138_p2), %s413_s13, 1  ;;  %s455_s18 = smov (!%p138_p2), 94  }
   0x6   : > { %141 = sbr.rel (%p138_p2) target bundleno = 310 (0x136), region = 32  ;;  %s456_s19 = smov (!%p138_p2), 95  }
   0x7   : > { %s457_s20 = smov (!%p138_p2), 96   ;;  %s458_s21 = smov (!%p138_p2), 110  }
   0x8   : > { %s459_s22 = smov (!%p138_p2), 111   ;;  %s460_s23 = smov (!%p138_p2), 112  }
   0x9   : > { %s461_s24 = smov (!%p138_p2), 126   ;;  %s462_s25 = smov (!%p138_p2), 127  }
   0xb   : > { %s540_s13 = smov (!%p161_p3, %s413_s13), 1  ;;  %vm174_vm0 = vcmask 769024   ;;  %vm254_vm1 = vcmask 785408   ;;  %vm268_vm2 = vcmask 777216   ;;  %vm240_vm3 = vcmask 900096   ;;  %v306_v19 = vld [vmem:[%s537_s2] sm:$0xff] }
   0xc   : > { %s426_s14 = sshll.u32 %s540_s13, 4  ;;  %v463_v20 = vmov 0   ;;  %vm226_vm4 = vcmask 908288   ;;  %vm212_vm5 = vcmask 916480   ;;  %vm198_vm6 = vcmask 1031168   ;;  %v287_v35 = vld [vmem:[%s536_s1] sm:$0xff] }
   0xd   : > { %s165_s17 = scalar_lea.vmem %s535_s0, %s426_s14  ;;  %445 = vset.pattern.permute.xlu1 %v463_v20  ;;  %446 = vset.pattern.permute.xlu0 %v463_v20  ;;  %vm184_vm7 = vcmask 1039360   ;;  %vm312_vm8 = vcmask 588800   ;;  %s170_s5 = scalar_lea.vmem %s538_s3, %s426_s14 }
   0xe   : > { %v500_v0 = vld [vmem:[%s165_s17] sm:$0xff]  ;;  %v275_v1 = vld [vmem:[%s165_s17 + $0x8] sm:$0xff] }
   0xf   : > { %278 = vrot.lane.b32.xlu0 %v500_v0, %s455_s18  ;;  %264 = vrot.lane.b32.xlu1 %v500_v0, %s456_s19  ;;  %175 = vst.msk [vmem:[#allocation2 + $0x8] sm:$0xff] %vm174_vm0, %v275_v1 }
  0x10   : > { %250 = vrot.lane.b32.xlu2 %v500_v0, %s457_s20 }
  0x16   : > { %v289_v37 = vld [vmem:[#allocation2 + $0x8] sm:$0xff] }
  0x17   : > { %280 = vrot.lane.b32.xlu0 %v275_v1, %s455_s18  ;;  %266 = vrot.lane.b32.xlu1 %v275_v1, %s456_s19 }
  0x18   : > { %252 = vrot.lane.b32.xlu2 %v275_v1, %s457_s20 }
  0x1f   : > { %238 = vrot.lane.b32.xlu1 %v275_v1, %s458_s21  ;;  %236 = vrot.lane.b32.xlu0 %v500_v0, %s458_s21 }
  0x20   : > { %222 = vrot.lane.b32.xlu2 %v500_v0, %s459_s22 }
  0x27   : > { %224 = vrot.lane.b32.xlu0 %v275_v1, %s459_s22  ;;  %208 = vrot.lane.b32.xlu1 %v500_v0, %s460_s23 }
  0x28   : > { %210 = vrot.lane.b32.xlu2 %v275_v1, %s460_s23 }
  0x2f   : > { %196 = vrot.lane.b32.xlu1 %v275_v1, %s461_s24  ;;  %194 = vrot.lane.b32.xlu0 %v500_v0, %s461_s24 }
  0x30   : > { %180 = vrot.lane.b32.xlu2 %v500_v0, %s462_s25 }
  0x37   : > { %182 = vrot.lane.b32.xlu0 %v275_v1, %s462_s25  ;;  %309 = vperm.xlu1 %445, %v306_v19  }
  0x6a   : > { %v251_v2 = vpop.permute.xlu2 %250 }
  0x72   : > { %v253_v3 = vpop.permute.xlu2 %252 }
  0x73   : > { %v255_v4 = vsel %vm254_vm1, %v251_v2, %v253_v3  ;;  %259 = vst.msk [vmem:[#allocation2 + $0x68] sm:$0xff] %vm174_vm0, %v253_v3 }
  0x7a   : > { %v223_v5 = vpop.permute.xlu2 %222  ;;  %v301_v18 = vld [vmem:[#allocation2 + $0x68] sm:$0xff] }
  0x81   : > { %v279_v6 = vpop.permute.xlu0 %278  ;;  %v265_v7 = vpop.permute.xlu1 %264 }
  0x82   : > { %v211_v8 = vpop.permute.xlu2 %210 }
  0x83   : > { %217 = vst.msk [vmem:[#allocation2 + $0x38] sm:$0xff] %vm174_vm0, %v211_v8 }
  0x89   : > { %v281_v9 = vpop.permute.xlu0 %280  ;;  %v267_v10 = vpop.permute.xlu1 %266 }
  0x8a   : > { %v282_v11 = vsel %vm174_vm0, %v279_v6, %v281_v9  ;;  %286 = vst.msk [vmem:[#allocation2 + $0x88] sm:$0xff] %vm174_vm0, %v281_v9  ;;  %v269_v12 = vsel %vm268_vm2, %v265_v7, %v267_v10  ;;  %v295_v29 = vld [vmem:[#allocation2 + $0x38] sm:$0xff]  ;;  %v181_v31 = vpop.permute.xlu2 %180 }
  0x8b   : > { %323 = vmatpush.msra.mxu0 %v282_v11  ;;  %273 = vst.msk [vmem:[#allocation2 + $0x78] sm:$0xff] %vm174_vm0, %v267_v10 }
  0x8d   : > { %324 = vmatpush.msra.mxu0 %v269_v12 }
  0x8f   : > { %325 = vmatpush.msra.mxu0 %v255_v4 }
  0x91   : > { %v239_v13 = vpop.permute.xlu1 %238  ;;  %v237_v14 = vpop.permute.xlu0 %236  ;;  %v305_v15 = vld [vmem:[#allocation2 + $0x88] sm:$0xff] }
  0x92   : > { %245 = vst.msk [vmem:[#allocation2 + $0x58] sm:$0xff] %vm174_vm0, %v239_v13  ;;  %v241_v16 = vsel %vm240_vm3, %v237_v14, %v239_v13  ;;  %343 = vmatpush.msra.mxu1 %v305_v15  ;;  %v303_v17 = vld [vmem:[#allocation2 + $0x78] sm:$0xff] }
  0x93   : > { %326 = vmatpush.msra.mxu0 %v241_v16 }
  0x94   : > { %344 = vmatpush.msra.mxu1 %v303_v17 }
  0x96   : > { %345 = vmatpush.msra.mxu1 %v301_v18 }
  0x99   : > { %v225_v21 = vpop.permute.xlu0 %224  ;;  %v209_v22 = vpop.permute.xlu1 %208  ;;  %v299_v23 = vld [vmem:[#allocation2 + $0x58] sm:$0xff] }
  0x9a   : > { %v227_v24 = vsel %vm226_vm4, %v223_v5, %v225_v21  ;;  %231 = vst.msk [vmem:[#allocation2 + $0x48] sm:$0xff] %vm174_vm0, %v225_v21  ;;  %v213_v25 = vsel %vm212_vm5, %v209_v22, %v211_v8  ;;  %346 = vmatpush.msra.mxu1 %v299_v23 }
  0x9b   : > { %327 = vmatpush.msra.mxu0 %v227_v24 }
  0x9d   : > { %328 = vmatpush.msra.mxu0 %v213_v25 }
  0xa1   : > { %v197_v26 = vpop.permute.xlu1 %196  ;;  %v195_v27 = vpop.permute.xlu0 %194  ;;  %v297_v28 = vld [vmem:[#allocation2 + $0x48] sm:$0xff] }
  0xa2   : > { %203 = vst.msk [vmem:[#allocation2 + $0x28] sm:$0xff] %vm174_vm0, %v197_v26  ;;  %v199_v30 = vsel %vm198_vm6, %v195_v27, %v197_v26  ;;  %347 = vmatpush.msra.mxu1 %v297_v28 }
  0xa3   : > { %329 = vmatpush.msra.mxu0 %v199_v30 }
  0xa4   : > { %348 = vmatpush.msra.mxu1 %v295_v29 }
  0xa9   : > { %v183_v32 = vpop.permute.xlu0 %182  ;;  %v293_v33 = vld [vmem:[#allocation2 + $0x28] sm:$0xff]  ;;  %v310_v38 = vpop.permute.xlu1 %309 }
  0xaa   : > { %189 = vst.msk [vmem:[#allocation2 + $0x18] sm:$0xff] %vm174_vm0, %v183_v32  ;;  %v185_v34 = vsel %vm184_vm7, %v181_v31, %v183_v32  ;;  %349 = vmatpush.msra.mxu1 %v293_v33 }
  0xab   : > { %330 = vmatpush.msra.mxu0 %v185_v34 }
  0xad   : > { %331 = vmatpush.msra.mxu0 %v500_v0 }
  0xae   : > { %422 = vmatmul.msk.f32.vlgmr.msra.gmra.mxu0 %vm312_vm8, %v287_v35 }
  0xb1   : > { %v291_v36 = vld [vmem:[#allocation2 + $0x18] sm:$0xff] }
  0xb2   : > { %350 = vmatpush.msra.mxu1 %v291_v36 }
  0xb4   : > { %351 = vmatpush.msra.mxu1 %v289_v37 }
  0xb5   : > { %423 = vmatmul.msk.f32.vlgmr.msra.gmra.mxu1 %vm312_vm8, %v287_v35 }
 0x12b   : > { %v333_v39 = vpop.f32.mrf.mxu0 }
 0x12c   : > { %v334_v40 = vadd.f32 %v333_v39, %v310_v38 }
 0x12e   : > { %356 = vst [vmem:[%s170_s5] sm:$0xff] %v334_v40 }
 0x132   : > { %v353_v41 = vpop.f32.mrf.mxu1 }
 0x133   : > { %v354_v42 = vadd.f32 %v353_v41, %v310_v38 }
 0x135   : > { %357 = vst [vmem:[%s170_s5 + $0x8] sm:$0xff] %v354_v42 }
 0x136 PF: > { %s13_s12 = sadd.s32 1, %s453_s12  }
 0x137   : > { %p10_p4 = scmp.ge.s32.totalorder %s13_s12, 4  }
 0x139   :  { %12 = sbr.rel (!%p10_p4) target bundleno = 1 (0x1), region = 62 }

</bundles_post_ra>
